<compile_context>
chip_gen: v7x
topology: tpu7x:2x2x1
jax: 0.10.0
libtpu: 0.0.40
codegen_flags: <defaults>
</compile_context>

<pallas_src>
from itertools import accumulate

import jax
import jax.numpy as jnp
from jax import lax
from jax.experimental import pallas as pl
from jax.experimental.pallas import tpu as pltpu


def _choose_class_tile(d: int, c: int, target_buf_bytes: int = 2 * 1024 * 1024) -> int:
    """Largest lane-aligned class tile whose bf16 weight buffer stays ~2 MiB."""
    tn_cap = max(128, ((target_buf_bytes // (2 * d)) // 128) * 128)
    if c <= tn_cap:
        # Whole shard in one tile; round up to a lane multiple (the array is
        # zero-padded to this size) so stores stay unmasked.
        return min(tn_cap, pl.cdiv(c, 128) * 128)
    return tn_cap


def _commonface_cos_kernel(emb_ref, ker_ref, cos_ref):
    """One (B, TN) tile of cos_theta = clamp(l2n(emb) @ l2n_cols(W), -1, 1)."""
    ker = ker_ref[...]                                     # (D, TN) bf16
    ker_f32 = ker.astype(jnp.float32)
    # Column 1/||w_c||: f32 reduction + rsqrt (EUP slot; v5e has no bf16 VPU).
    col_inv = lax.rsqrt(
        jnp.sum(ker_f32 * ker_f32, axis=0, keepdims=True) + 1e-12)
    # bf16 x bf16 -> f32 on the MXU; fold the column norm into the output
    # instead of normalizing the whole D x TN weight tile elementwise.
    acc = jnp.dot(emb_ref[...], ker, preferred_element_type=jnp.float32)
    cos_ref[...] = jnp.clip(acc * col_inv, -1.0, 1.0)


def _build_logits_fn(B, D, C, C_pad, TN, lo, hi):
    """Jitted fn: (embeddings, labels, padded bf16 weights) -> (cos, part_labels)."""
    grid = (C_pad // TN,)

    cos_call = pl.pallas_call(
        _commonface_cos_kernel,
        out_shape=jax.ShapeDtypeStruct((B, C_pad), jnp.float32),
        grid=grid,
        in_specs=[
            # Normalized embeddings: same block index every step -> loaded
            # once, kept resident in VMEM across all class tiles.
            pl.BlockSpec((B, D), lambda j: (0, 0)),
            # Weight tile streamed (double-buffered) from HBM.
            # TODO(synk): sweep pipeline_mode=pl.Buffered(3) on this spec.
            pl.BlockSpec((D, TN), lambda j: (0, j)),
        ],
        out_specs=pl.BlockSpec((B, TN), lambda j: (0, j)),
        compiler_params=pltpu.CompilerParams(
            # v7x: split class tiles across the 2 TensorCores; no-op on v5e/v6e.
            dimension_semantics=("parallel",),
        ),
    )

    def fn(embeddings, labels, ker_pad_bf16):
        emb = embeddings.astype(jnp.float32)
        # l2_norm(embeddings, axis=1), hoisted out of the kernel so it runs
        # once (not once per class tile). eps guards all-zero rows.
        inv = lax.rsqrt(jnp.sum(emb * emb, axis=1, keepdims=True) + 1e-12)
        emb_norm = (emb * inv).astype(jnp.bfloat16)

        cos_pad = cos_call(emb_norm, ker_pad_bf16)
        cos_theta = cos_pad[:, :C]                         # drop zero-padded cols

        # _generate_part_labels: O(B) integer work -> plain JAX.
        lab = labels.reshape(-1, 1).astype(jnp.int32)
        in_shard = (lab >= lo) & (lab < hi)
        ignored = lab == -1
        part_labels = jnp.where(
            in_shard,
            lab - lo,
            jnp.where(ignored, jnp.int32(-1), jnp.int32(-2)),
        ).astype(jnp.int32)
        return cos_theta, part_labels

    return jax.jit(fn)


class CommonFacePallas:
    """JAX/Pallas port of the CommonFace head's _calc_logits path."""

    def __init__(self, in_features, gpu_index, weight_init, class_split,
                 tile_n=None):
        self.in_features = in_features
        self.gpu_index = gpu_index
        self.out_features = class_split[gpu_index]
        self.shard_start = [0] + list(accumulate(class_split))
        lo = self.shard_start[gpu_index]
        hi = self.shard_start[gpu_index + 1]
        self._lo, self._hi = lo, hi

        # select_weight_init = weight_init[:, lo:hi]  (this shard's Parameter)
        w = jnp.asarray(weight_init[:, lo:hi], dtype=jnp.float32)
        self.kernel = w                              # f32 "Parameter" copy

        D, C = w.shape
        tn = tile_n if tile_n is not None else _choose_class_tile(D, C)
        c_pad = pl.cdiv(C, tn) * tn
        # bf16 weights in HBM; zero-pad the class dim to a tile multiple so
        # every kernel store is lane-dense / unmasked. Padded columns produce
        # cos == 0 (dot is 0) and are sliced off after the kernel.
        w_bf16 = w.astype(jnp.bfloat16)
        if c_pad != C:
            w_bf16 = jnp.pad(w_bf16, ((0, 0), (0, c_pad - C)))
        self._kernel_bf16 = w_bf16
        self._tn = tn
        self._c_pad = c_pad
        self._logits_cache = {}

        # TODO(synk): if B grows large (>~1024), add a B-tile grid axis too.

    def _get_logits_fn(self, B):
        fn = self._logits_cache.get(B)
        if fn is None:
            D, C = self.kernel.shape
            fn = _build_logits_fn(B, D, C, self._c_pad, self._tn,
                                  self._lo, self._hi)
            self._logits_cache[B] = fn
        return fn

    def calc_logits(self, embeddings, labels):
        B = embeddings.shape[0]
        cos_theta, part_labels = self._get_logits_fn(B)(
            embeddings, labels, self._kernel_bf16)

        # original_logits = cos_theta.clone().detach()
        original_logits = lax.stop_gradient(cos_theta)

        # index = torch.where(part_labels > -1)[0]: data-dependent output size,
        # so computed in eager JAX outside the jitted region.
        # TODO(synk): use jnp.nonzero(..., size=B, fill_value=-1) if this path
        # ever needs to live under jax.jit.
        index = jnp.nonzero(part_labels.reshape(-1) > -1)[0]

        return index, part_labels, cos_theta, original_logits


def _reference(embeddings, kernel_f32, labels, lo, hi):
    """Plain-JAX f32 reference (mirrors the torch module)."""
    emb = embeddings / jnp.linalg.norm(embeddings, axis=1, keepdims=True)
    ker = kernel_f32 / jnp.linalg.norm(kernel_f32, axis=0, keepdims=True)
    cos = jnp.clip(emb @ ker, -1.0, 1.0)
    lab = labels.reshape(-1, 1)
    in_shard = (lab >= lo) & (lab < hi)
    ignored = lab == -1
    plab = jnp.where(in_shard, lab - lo, jnp.where(ignored, -1, -2))
    return cos, plab.astype(jnp.int32)


if __name__ == "__main__":
    key = jax.random.PRNGKey(0)
    k_emb, k_w, k_lab = jax.random.split(key, 3)

    B = 8                                  # batch (multiple of 8 sublanes)
    D = 64                                 # in_features
    class_split = [512, 640, 512]          # shard sizes
    gpu_index = 1                          # -> C_shard = 640, range [512, 1152)
    total_classes = sum(class_split)

    embeddings = jax.random.normal(k_emb, (B, D), dtype=jnp.float32)
    weight_init = jax.random.normal(k_w, (D, total_classes), dtype=jnp.float32)
    # labels include in-shard, out-of-shard, and ignore (-1) cases.
    labels = jax.random.randint(k_lab, (B,), -1, total_classes, dtype=jnp.int32)

    # tile_n=256 forces a 3-step grid (C padded 640 -> 768) to exercise the
    # class-tile pipeline and the zero-pad/slice path at small shapes.
    head = CommonFacePallas(D, gpu_index, weight_init, class_split, tile_n=256)
    index, part_labels, cos_theta, original_logits = head.calc_logits(
        embeddings, labels)
    jax.block_until_ready((index, part_labels, cos_theta, original_logits))

    # Verify against the plain-JAX f32 reference (kernel uses bf16 operands
    # with f32 accumulation -> small tolerance).
    ref_cos, ref_plab = _reference(embeddings, head.kernel, labels,
                                   head._lo, head._hi)
    ref_index = jnp.nonzero(ref_plab.reshape(-1) > -1)[0]

    assert cos_theta.shape == (B, head.out_features), "cos_theta shape mismatch"
    assert jnp.allclose(cos_theta, ref_cos, atol=2e-2), "cos_theta mismatch"
    assert jnp.array_equal(part_labels, ref_plab), "part_labels mismatch"
    assert jnp.array_equal(index, ref_index), "index mismatch"
    assert jnp.array_equal(original_logits, cos_theta), "original_logits mismatch"

    print("KERNEL_OK")
</pallas_src>

<mosaic_0001>
module attributes {stable_mosaic.version = 11 : i64} {
  func.func @_commonface_cos_kernel(%arg0: i32, %arg1: memref<8x64xbf16, #tpu.memory_space<vmem>>, %arg2: memref<64x256xbf16, #tpu.memory_space<vmem>>, %arg3: memref<8x256xf32, #tpu.memory_space<vmem>>) attributes {dimension_semantics = [#tpu.dimension_semantics<parallel>], iteration_bounds = array<i64: 3>, scalar_prefetch = 0 : i64, scratch_operands = 0 : i64, tpu.core_type = #tpu.core_type<tc>, window_params = [{pipeline_mode = #tpu.pipeline_mode<synchronous>, transform_indices = @transform_0, window_bounds = array<i64: 8, 64>}, {transform_indices = @transform_1, window_bounds = array<i64: 64, 256>}, {transform_indices = @transform_2, window_bounds = array<i64: 8, 256>}]} {
    %c0 = arith.constant 0 : index
    %c0_0 = arith.constant 0 : index
    %0 = vector.load %arg2[%c0, %c0_0] : memref<64x256xbf16, #tpu.memory_space<vmem>>, vector<64x256xbf16>
    %1 = arith.extf %0 : vector<64x256xbf16> to vector<64x256xf32>
    %2 = arith.mulf %1, %1 : vector<64x256xf32>
    %cst = arith.constant dense<0.000000e+00> : vector<256xf32>
    %3 = vector.multi_reduction <add>, %2, %cst [0] : vector<64x256xf32> to vector<256xf32>
    %4 = vector.shape_cast %3 : vector<256xf32> to vector<1x256xf32>
    %cst_1 = arith.constant 9.99999996E-13 : f32
    %5 = vector.broadcast %cst_1 : f32 to vector<1x256xf32>
    %6 = arith.addf %4, %5 : vector<1x256xf32>
    %7 = math.rsqrt %6 : vector<1x256xf32>
    %c0_2 = arith.constant 0 : index
    %c0_3 = arith.constant 0 : index
    %8 = vector.load %arg1[%c0_2, %c0_3] : memref<8x64xbf16, #tpu.memory_space<vmem>>, vector<8x64xbf16>
    %cst_4 = arith.constant dense<0.000000e+00> : vector<8x256xf32>
    %9 = tpu.matmul %8, %0, %cst_4 {dimension_numbers = #tpu.dot_dimension_numbers<[1], [0], [0], [1], [0, 0, 1, 1], [], []>} : vector<8x64xbf16>, vector<64x256xbf16>, vector<8x256xf32> -> vector<8x256xf32>
    %10 = vector.broadcast %7 : vector<1x256xf32> to vector<8x256xf32>
    %11 = arith.mulf %9, %10 : vector<8x256xf32>
    %cst_5 = arith.constant -1.000000e+00 : f32
    %cst_6 = arith.constant 1.000000e+00 : f32
    %12 = vector.broadcast %cst_5 : f32 to vector<8x256xf32>
    %13 = arith.maximumf %12, %11 : vector<8x256xf32>
    %14 = vector.broadcast %cst_6 : f32 to vector<8x256xf32>
    %15 = arith.minimumf %14, %13 : vector<8x256xf32>
    %c0_7 = arith.constant 0 : index
    %c0_8 = arith.constant 0 : index
    %16 = vector.load %arg3[%c0_7, %c0_8] : memref<8x256xf32, #tpu.memory_space<vmem>>, vector<8x256xf32>
    tpu.vector_store %arg3[%c0_7, %c0_8], %15 {strides = array<i32>} : memref<8x256xf32, #tpu.memory_space<vmem>>, vector<8x256xf32>,
    return
  }
  func.func @transform_0(%arg0: i32) -> (i32, i32) {
    %c0_i32 = arith.constant 0 : i32
    %c0_i32_0 = arith.constant 0 : i32
    %c0_i32_1 = arith.constant 0 : i32
    return %c0_i32, %c0_i32_0 : i32, i32
  }
  func.func @transform_1(%arg0: i32) -> (i32, i32) {
    %c0_i32 = arith.constant 0 : i32
    %c0_i32_0 = arith.constant 0 : i32
    return %c0_i32, %arg0 : i32, i32
  }
  func.func @transform_2(%arg0: i32) -> (i32, i32) {
    %c0_i32 = arith.constant 0 : i32
    %c0_i32_0 = arith.constant 0 : i32
    return %c0_i32, %arg0 : i32, i32
  }
}

</mosaic_0001>

<bundles_post_ra>
// kernel: fn.1
= control target key start
LH: loop header
LB: loop body
LE: loop exit
PB: predicated region body
PF: predicated region fallthrough
CT: control target
= control target key end

     0   :  { %7 = vsyncpa [#allocation3], 0  ;;  %s697_s0 = inlined_call_operand.vmem [shape: bf16[8,64], index: 0, kind: input, shape index: {}]   ;;  %s698_s1 = inlined_call_operand.hbm [shape: bf16[64,768], index: 1, kind: input, shape index: {}]   ;;  %s699_s2 = inlined_call_operand.vmem [shape: f32[8,768], index: 2, kind: output, shape index: {}]  }
   0x1   :  { %9 = vsyncpa [#allocation3 + $0x1], 0  ;;  %s589_s9 = smov 0   ;;  %s591_s10 = smov 0  }
   0x2   :  { %s593_s11 = smov 0   ;;  %s595_s12 = smov 0  }
   0x3 LB: > { %s398_s13 = sadd.s32 4294967295, %s566_s12   ;;  %s609_s14 = sadd.s32 1, %s566_s12   ;;  %s566_s12 = sphi %s595_s12, %s705_s12   ;;  %s562_s11 = sphi %s593_s11, %s704_s11   ;;  %s558_s10 = sphi %s591_s10, %s703_s10   ;;  %s554_s9 = sphi %s589_s9, %s702_s9  }
   0x4   : > { %s40_s15 = ssub.s32 %s566_s12, %s609_s14  ;;  %s43_s16 = sadd.s32 1, %s562_s11 }
   0x5   : > { %p41_p0 = scmp.eq.s32.totalorder %s40_s15, 0  ;;  %p50_p1 = scmp.ne.s32.totalorder %s562_s11, %s558_s10 }
   0x6   : > { %p51_p2 = scmp.eq.s32.totalorder %s566_s12, 0  ;;  %p56_p3 = scmp.ne.s32.totalorder %s558_s10, %s554_s9 }
   0x7   : > { %s619_s17 = scalar_select %p41_p0, %s562_s11, %s43_s16  }
   0x8   : > { %p52_p4 = por %p51_p2, %p50_p1  ;;  %p57_p5 = scmp.eq.s32.totalorder %s398_s13, 0 }
   0x9   : > { %p429_p6 = scmp.lt.s32.totalorder %s566_s12, 3  ;;  %s109_s19 = sand.u32 1, %s562_s11  }
   0xa   : > { %p624_p7 = por %p57_p5, %p56_p3  ;;  %s402_s20 = sshll.u32 %s109_s19, 6 }
   0xb   : > { %s422_s21 = sshll.u32 %s566_s12, 7  ;;  %s113_s25 = scalar_lea.vmem [#allocation2], %s402_s20 }
   0xc   : > { %s633_s24 = scalar_lea.hbm %s698_s1, %s422_s21  ;;  %s120_s26 = sshll.u32 %s113_s25, 4  ;;  %s635_s26 = int_to_ptr.vmem [resolvable:$true] %s120_s26 }
   0xd   : > { %p637_p8 = pnand %p429_p6, %p52_p4  ;;  %s641_s28 = scalar_lea.sflag [#allocation3], %s109_s19 }
   0xe   : > { %s478_s29 = scalar_lea.hbm %s633_s24, 1024  ;;  %s483_s4 = scalar_lea.hbm %s698_s1, 3072 }
   0xf   : > { %p479_p9 = scmp.ne.s32.totalorder %s633_s24, %s478_s29  ;;  %p480_p10 = pneg %p637_p8 }
  0x10   : > { %p484_p13 = scmp.lt.u32.totalorder %s633_s24, %s698_s1  ;;  %p485_p0 = scmp.lt.u32.totalorder %s483_s4, %s478_s29 }
  0x11   : > { %p481_p11 = pnand %p480_p10, %p479_p9  ;;  %p487_p2 = scmp.lt.u32.totalorder %s478_s29, %s633_s24 }
  0x12   : > { %p486_p1 = por %p485_p0, %p484_p13 }
  0x13   : > { %p482_p12 = pneg %p481_p11 }
  0x14   : > { %p488_p3 = por %p487_p2, %p486_p1 }
  0x16   : > { %p489_p4 = pnand %p488_p3, %p482_p12 }
  0x18   : > { %492 = shalt.err (!%p489_p4)
}
  0x19   : > { %s493_s7 = scalar_lea.vmem %s635_s26, 1024  ;;  %s568_s8 = smov [#allocation2]  }
  0x1a   : > { %p494_p5 = scmp.ne.s32.totalorder %s635_s26, %s493_s7  ;;  %s498_s9 = sshll.u32 %s568_s8, 4  ;;  %s499_s9 = int_to_ptr.vmem [resolvable:$false] %s498_s9 }
  0x1b   : > { %s500_s15 = scalar_lea.vmem %s499_s9, 2048  ;;  %p501_p11 = scmp.lt.s32.totalorder %s635_s26, %s499_s9 }
  0x1c   : > { %p496_p6 = pnand %p494_p5, %p480_p10  ;;  %p502_p13 = scmp.lt.s32.totalorder %s500_s15, %s493_s7 }
  0x1e   : > { %p497_p9 = pneg %p496_p6  ;;  %p503_p0 = por %p502_p13, %p501_p11 }
  0x20   : > { %p504_p1 = pnand %p503_p0, %p497_p9 }
  0x22   : > { %507 = shalt.err (!%p504_p1)
}
  0x23   : > { %s569_s16 = smov 384   ;;  %s570_s19 = smov 128  }
  0x24   : > { %s571_s20 = smov 8   ;;  %p405_p10 = scmp.ge.s32.totalorder %s566_s12, 1 }
  0x25   : > { %428 = dma.hbm_to_vmem [thread:$0]  (!%p637_p8), %s633_s24, 1024, %s635_s26, %s641_s28, %s569_s16, %s570_s19, %s571_s20  }
  0x26   : > { %p128_p12 = scmp.lt.s32.totalorder %s566_s12, 4 }
  0x28   : > { %p129_p2 = pnand %p405_p10, %p128_p12 }
  0x29   : > { %s134_s21 = sand.u32 (!%p129_p2), 1, %s558_s10  }
  0x2a   : > { %132 = sbr.rel (%p129_p2) target bundleno = 287 (0x11f), region = 28  ;;  %s406_s22 = sshll.u32 (!%p129_p2), %s134_s21, 6 }
  0x2b   : > { %s135_s23 = scalar_lea.sflag (!%p129_p2), [#allocation3], %s134_s21  ;;  %s138_s25 = scalar_lea.vmem (!%p129_p2), [#allocation2], %s406_s22 }
  0x31   : > { %525 = dma.done.wait (%p624_p7), %s135_s23, 1024  }
  0x32   : > { %527 = vsyncadd (%p624_p7), %s135_s23, 4294966272  ;;  %v572_v0 = vmov 0   ;;  %v167_v1 = vld [vmem:[%s138_s25] sm:$0xff]  ;;  %v168_v2 = vld [vmem:[%s138_s25 + $0x8] sm:$0xff]  ;;  %v573_v21 = vmov 1935823168   ;;  %v542_v24 = vlaneseq }
  0x33   : > { %314 = vmatprep.mubr.bf16.mxu0 %v572_v0  ;;  %v169_v3 = vld [vmem:[%s138_s25 + $0x10] sm:$0xff]  ;;  %v410_v4 = vcombine.high %v167_v1, %v168_v2  ;;  %v409_v5 = vcombine.low %v167_v1, %v168_v2  ;;  %v170_v6 = vld [vmem:[%s138_s25 + $0x18] sm:$0xff]  ;;  %528 = vmul.bf16.f32.vacc0 %v167_v1, %v167_v1  ;;  %v171_v9 = vld [vmem:[%s138_s25 + $0x20] sm:$0xff]  ;;  %v540_v22 = vunpack.c.l.s4 %v573_v21  ;;  %s407_s26 = sshll.u32 %s398_s13, 1 }
  0x34   : > { %529 = vmac.bf16.f32.vacc0 %v168_v2, %v168_v2  ;;  %v412_v7 = vcombine.high %v169_v3, %v170_v6  ;;  %v411_v8 = vcombine.low %v169_v3, %v170_v6  ;;  %v172_v10 = vld [vmem:[%s138_s25 + $0x28] sm:$0xff]  ;;  %v173_v13 = vld [vmem:[%s138_s25 + $0x30] sm:$0xff]  ;;  %v174_v14 = vld [vmem:[%s138_s25 + $0x38] sm:$0xff]  ;;  %v543_v25 = vshrl.u32 %v542_v24, 7  ;;  %p161_p7 = scmp.lt.s32.totalorder %s407_s26, 5 }
  0x35   : > { %282 = vmatprep.subr.bf16.mxu0 %v410_v4  ;;  %530 = vmac.bf16.f32.vacc0 %v169_v3, %v169_v3  ;;  %v414_v11 = vcombine.high %v171_v9, %v172_v10  ;;  %v413_v12 = vcombine.low %v171_v9, %v172_v10  ;;  %v416_v15 = vcombine.high %v173_v13, %v174_v14  ;;  %v237_v29 = vld [vmem:[%s697_s0] sm:$0xf] }
  0x36   : > { %283 = vmatpush1.bf16.msra.mxu0 %v409_v5  ;;  %531 = vmac.bf16.f32.vacc0 %v170_v6, %v170_v6  ;;  %v415_v16 = vcombine.low %v173_v13, %v174_v14  ;;  %v541_v23 = vunpack.c.0.s8 %v540_v22  ;;  %vm278_vm0 = vcmask 523264   ;;  %s707_s26 = smov (!%p161_p7, %s407_s26), 5 }
  0x37   : > { %284 = vmatprep.subr.bf16.mxu0 %v412_v7  ;;  %532 = vmac.bf16.f32.vacc0 %v171_v9, %v171_v9  ;;  %s408_s27 = sshll.u32 %s707_s26, 3 }
  0x38   : > { %533 = vmac.bf16.f32.vacc0 %v172_v10, %v172_v10  ;;  %v544_v26 = vsub.s32 %v541_v23, %v543_v25  ;;  %s164_s30 = scalar_lea.vmem %s699_s2, %s408_s27 }
  0x39   : > { %534 = vmac.bf16.f32.vacc0 %v173_v13, %v173_v13 }
  0x3a   : > { %285 = vmatpush1.bf16.msra.mxu0 %v411_v8  ;;  %535 = vmac.bf16.f32.vacc0 %v174_v14, %v174_v14 }
  0x3b   : > { %286 = vmatprep.subr.bf16.mxu0 %v414_v11 }
  0x3c   : > { %v536_v17 = vmovacc.add.low.vacc0 }
  0x3d   : > { %v537_v18 = vmovacc.add.high.vacc0 }
  0x3e   : > { %287 = vmatpush1.bf16.msra.mxu0 %v413_v12 }
  0x3f   : > { %288 = vmatprep.subr.bf16.mxu0 %v416_v15  ;;  %v538_v19 = vcombine.low %v536_v17, %v537_v18  ;;  %v539_v20 = vcombine.high %v536_v17, %v537_v18 }
  0x41   : > { %v545_v27 = vrot.slane %v538_v19, %v544_v26  ;;  %v551_v28 = vrot.slane %v539_v20, %v544_v26 }
  0x42   : > { %289 = vmatpush1.bf16.msra.mxu0 %v415_v16 }
  0x43   : > { %v214_v30 = vrot.slane %v545_v27, 4  ;;  %v227_v31 = vrot.slane %v551_v28, 4 }
  0x45   : > { %417 = vmatmul.mubr.msk.bf16.vlgmr.msra.gmra.mrb[0].mxu0 %vm278_vm0, %v237_v29  ;;  %v215_v32 = vadd.f32 %v545_v27, %v214_v30  ;;  %v228_v33 = vadd.f32 %v551_v28, %v227_v31 }
  0x47   : > { %v216_v34 = vrot.slane %v215_v32, 2  ;;  %v229_v35 = vrot.slane %v228_v33, 2 }
  0x49   : > { %v217_v36 = vadd.f32 %v216_v34, %v215_v32  ;;  %v230_v37 = vadd.f32 %v229_v35, %v228_v33 }
  0x4b   : > { %v218_v38 = vrot.slane %v217_v36, 1  ;;  %v231_v39 = vrot.slane %v230_v37, 1 }
  0x4d   : > { %v219_v40 = vadd.f32 %v218_v38, %v217_v36  ;;  %v232_v41 = vadd.f32 %v231_v39, %v230_v37 }
  0x4f   : > { %v233_v42 = vadd.f32 1e-12, %v219_v40  ;;  %v234_v43 = vadd.f32 1e-12, %v232_v41 }
  0x51   : > { %474 = vrsqrt.f32 %v233_v42 }
  0x52   : > { %476 = vrsqrt.f32 %v234_v43 }
  0x5b   : > { %v475_v44 = vpop.eup %474 }
  0x5c   : > { %v477_v45 = vpop.eup %476 }
 0x118   : > { %v316_v46 = vpop.f32.mrb[0].mxu0 }
 0x119   : > { %v323_v47 = vmul.f32 %v475_v44, %v316_v46  ;;  %v318_v48 = vpop.f32.mrb[1].mxu0 }
 0x11a   : > { %v324_v49 = vmul.f32 %v477_v45, %v318_v48  ;;  %v320_v50 = vpop.f32.mrb[2].mxu0 }
 0x11b   : > { %v418_v51 = vclamps-f32 %v323_v47, 1.0  ;;  %v321_v52 = vpop.f32.mrb[3].mxu0 }
 0x11c   : > { %v419_v53 = vclamps-f32 %v324_v49, 1.0 }
 0x11d   : > { %329 = vst [vmem:[%s164_s30] sm:$0xff] %v418_v51 }
 0x11e   : > { %330 = vst [vmem:[%s164_s30 + $0x8] sm:$0xff] %v419_v53 }
 0x11f PF: > { %p12_p8 = scmp.ge.s32.totalorder %s609_s14, 5   ;;  %s702_s9 = smov %s558_s10 }
 0x120   : > { %s703_s10 = smov %s562_s11  ;;  %s704_s11 = smov %s619_s17 }
 0x121   : > { %s705_s12 = smov %s609_s14  ;;  %14 = sbr.rel (!%p12_p8) target bundleno = 3 (0x3), region = 68 }
 0x128   :  { %353 = vsyncpa [#allocation3], 1 }
 0x129   :  { %355 = vsyncpa [#allocation3 + $0x1], 1 }

</bundles_post_ra>
